<compile_context>
chip_gen: v7x
topology: tpu7x:2x2x1
jax: 0.10.0
libtpu: 0.0.40
codegen_flags: <defaults>
</compile_context>

<pallas_src>
import jax
import jax.numpy as jnp
from jax.experimental import pallas as pl
from jax.experimental.pallas import tpu as pltpu


# ----------------------------------------------------------------------------
# Pallas kernel: slice (via BlockSpec) + HWC->CHW transpose + per-batch store
# ----------------------------------------------------------------------------
def _slice_permute_bcast_kernel(w_ref, o_ref):
    # w_ref: (h, w, c_tile)   channels-last tile of the embedding-table slice
    # o_ref: (1, c_tile, h*w) channels-first output tile for one batch element
    tile = w_ref[...]
    h, w, c_tile = tile.shape
    flat = tile.reshape(h * w, c_tile)      # collapse major dims (layout no-op)
    o_ref[0] = flat.T                       # XLU transpose -> lane-dense store


def position_embedding_learned_v2(mask, pos_embed_weight, *, num_pos=(50, 50),
                                  c_tile=None):
    """mask: (bs, h, w) -> (bs, C, h, w) learned absolute position embedding."""
    bs = mask.shape[0]
    h, w = mask.shape[-2], mask.shape[-1]
    C = pos_embed_weight.shape[-1]
    assert h <= num_pos[0] and w <= num_pos[1]

    # Slice of the embedding table covering the feature map (indexing glue only;
    # no compute, no transpose here).
    w_hw = pos_embed_weight.reshape(num_pos[0], num_pos[1], C)[:h, :w]  # (h, w, C)

    if c_tile is None:
        # Large lane-aligned channel blocks; the batch axis already provides
        # >= 2 parallel grid steps (v7x megacore) whenever bs >= 2.
        c_tile = 256 if C % 256 == 0 else (128 if C % 128 == 0 else C)
    n_ct = C // c_tile
    hw = h * w

    out = pl.pallas_call(
        _slice_permute_bcast_kernel,
        out_shape=jax.ShapeDtypeStruct((bs, C, hw), pos_embed_weight.dtype),
        grid=(n_ct, bs),   # batch innermost: weight tile stays resident across b
        in_specs=[pl.BlockSpec((h, w, c_tile), lambda c, b: (0, 0, c))],
        out_specs=pl.BlockSpec((1, c_tile, hw), lambda c, b: (b, c, 0)),
        compiler_params=pltpu.CompilerParams(
            dimension_semantics=("parallel", "parallel")),
    )(w_hw)

    # Free reshape (same row-major layout) back to the module's NCHW output.
    return out.reshape(bs, C, h, w)


# ----------------------------------------------------------------------------
if __name__ == "__main__":
    bs, h, w = 2, 16, 16
    num_pos = (50, 50)
    num_pos_feats = 256

    key = jax.random.PRNGKey(0)
    # nn.init.normal_(self.pos_embed.weight)
    pos_embed_weight = jax.random.normal(
        key, (num_pos[0] * num_pos[1], num_pos_feats), jnp.float32)

    # Padding mask: only its shape is consumed by the module's forward.
    rows = jnp.arange(h)[:, None]
    cols = jnp.arange(w)[None, :]
    mask1 = (rows >= 12) | (cols >= 12)
    mask = jnp.stack([jnp.zeros((h, w), bool), mask1], axis=0)   # (bs, h, w)

    out = jax.block_until_ready(
        position_embedding_learned_v2(mask, pos_embed_weight, num_pos=num_pos))
    assert out.shape == (bs, num_pos_feats, h, w)

    # Pure-JAX reference mirroring the PyTorch forward exactly.
    ref = pos_embed_weight.reshape(num_pos[0], num_pos[1], num_pos_feats)[:h, :w]
    ref = jnp.broadcast_to(jnp.transpose(ref, (2, 0, 1))[None],
                           (bs, num_pos_feats, h, w))
    assert jnp.array_equal(out, ref)   # pure data movement -> exact match

    print("KERNEL_OK")
</pallas_src>

<mosaic_0001>
module attributes {stable_mosaic.version = 11 : i64} {
  func.func @_slice_permute_bcast_kernel(%arg0: i32, %arg1: i32, %arg2: memref<16x16x256xf32, #tpu.memory_space<vmem>>, %arg3: memref<1x256x256xf32, #tpu.memory_space<vmem>>) attributes {dimension_semantics = [#tpu.dimension_semantics<parallel>, #tpu.dimension_semantics<parallel>], iteration_bounds = array<i64: 1, 2>, scalar_prefetch = 0 : i64, scratch_operands = 0 : i64, tpu.core_type = #tpu.core_type<tc>, window_params = [{transform_indices = @transform_0, window_bounds = array<i64: 16, 16, 256>}, {transform_indices = @transform_1, window_bounds = array<i64: 1, 256, 256>}]} {
    %c0 = arith.constant 0 : index
    %c0_0 = arith.constant 0 : index
    %c0_1 = arith.constant 0 : index
    %0 = vector.load %arg2[%c0, %c0_0, %c0_1] : memref<16x16x256xf32, #tpu.memory_space<vmem>>, vector<16x16x256xf32>
    %1 = vector.shape_cast %0 : vector<16x16x256xf32> to vector<256x256xf32>
    %2 = tpu.transpose %1, [1, 0] : vector<256x256xf32> -> vector<256x256xf32>
    %c0_2 = arith.constant 0 : index
    %c0_3 = arith.constant 0 : index
    %c0_4 = arith.constant 0 : index
    %3 = vector.load %arg3[%c0_2, %c0_3, %c0_4] : memref<1x256x256xf32, #tpu.memory_space<vmem>>, vector<1x256x256xf32>
    %4 = vector.shape_cast %3 : vector<1x256x256xf32> to vector<256x256xf32>
    %5 = vector.shape_cast %2 : vector<256x256xf32> to vector<1x256x256xf32>
    tpu.vector_store %arg3[%c0_2, %c0_3, %c0_4], %5 {strides = array<i32>} : memref<1x256x256xf32, #tpu.memory_space<vmem>>, vector<1x256x256xf32>,
    return
  }
  func.func @transform_0(%arg0: i32, %arg1: i32) -> (i32, i32, i32) {
    %c0_i32 = arith.constant 0 : i32
    %c0_i32_0 = arith.constant 0 : i32
    %c0_i32_1 = arith.constant 0 : i32
    return %c0_i32, %c0_i32_0, %arg0 : i32, i32, i32
  }
  func.func @transform_1(%arg0: i32, %arg1: i32) -> (i32, i32, i32) {
    %c0_i32 = arith.constant 0 : i32
    %c0_i32_0 = arith.constant 0 : i32
    return %arg1, %arg0, %c0_i32 : i32, i32, i32
  }
}

</mosaic_0001>

<bundles_post_ra>
// kernel: tpu_custom_call.1
= control target key start
LH: loop header
LB: loop body
LE: loop exit
PB: predicated region body
PF: predicated region fallthrough
CT: control target
= control target key end

     0   :  { %6 = vsyncpa [#allocation3], 0  ;;  %s912_s0 = inlined_call_operand.hbm [shape: f32[16,16,256], index: 0, kind: input, shape index: {}]   ;;  %s913_s1 = inlined_call_operand.hbm [shape: f32[2,256,256], index: 1, kind: output, shape index: {}]  }
   0x1   :  { %7 = vsyncpa [#allocation4], 0 }
   0x2   :  { %9 = vsyncpa [#allocation4 + $0x1], 0  ;;  %s693_s6 = smov 0   ;;  %s695_s7 = smov 0  }
   0x3   :  { %s697_s8 = smov 0   ;;  %s699_s9 = smov 0  }
   0x4   :  { %s701_s10 = smov 0   ;;  %s703_s11 = smov 0  }
   0x5 LB: > { %s482_s12 = sadd.s32 4294967295, %s675_s11   ;;  %s483_s13 = sadd.s32 4294967294, %s675_s11   ;;  %s675_s11 = sphi %s703_s11, %s15_s11   ;;  %s671_s10 = sphi %s701_s10, %s931_s10   ;;  %s667_s9 = sphi %s699_s9, %s930_s9   ;;  %s663_s8 = sphi %s697_s8, %s929_s8   ;;  %s659_s7 = sphi %s695_s7, %s928_s7   ;;  %s655_s6 = sphi %s693_s6, %s927_s6  }
   0x6   : > { %s24_s14 = sadd.s32 1, %s671_s10  ;;  %s62_s15 = sadd.s32 1, %s663_s8 }
   0x7   : > { %p25_p0 = scmp.ge.s32.totalorder %s24_s14, 2  ;;  %p72_p1 = scmp.ne.s32.totalorder %s663_s8, %s659_s7 }
   0x8   : > { %p73_p2 = scmp.eq.s32.totalorder %s482_s12, 1  ;;  %p78_p3 = scmp.ne.s32.totalorder %s659_s7, %s655_s6 }
   0x9   : > { %s933_s14 = smov (%p25_p0, %s24_s14), 0  ;;  %p79_p5 = scmp.eq.s32.totalorder %s483_s13, 1 }
   0xa   : > { %p733_p4 = por %p73_p2, %p72_p1  ;;  %s57_s17 = ssub.s32 %s671_s10, %s933_s14 }
   0xb   : > { %p484_p6 = scmp.ge.s32.totalorder %s675_s11, 1  ;;  %p60_p7 = scmp.eq.s32.totalorder %s57_s17, 0 }
   0xc   : > { %s918_s16 = scalar_select %p733_p4, 1, 0 }
   0xd   : > { %p740_p8 = por %p79_p5, %p78_p3  ;;  %p86_p9 = scmp.lt.s32.totalorder %s675_s11, 3 }
   0xe   : > { %s746_s19 = scalar_select %p60_p7, %s663_s8, %s62_s15  }
   0xf   : > { %s919_s18 = scalar_select %p740_p8, 1, 0 }
  0x10   : > { %p748_p10 = pnand %p484_p6, %p86_p9  ;;  %p752_p11 = scmp.eq.s32.totalorder %s482_s12, 0 }
  0x11   : > { %s677_s22 = smov [#allocation2]   ;;  %s565_s27 = scalar_lea.hbm %s912_s0, 8192 }
  0x12   : > { %s920_s20 = scalar_select %p748_p10, 1, 0 }
  0x13   : > { %s921_s21 = scalar_select %p752_p11, 1, 0 }
  0x14   : > { %p501_p12 = pneg %p748_p10  ;;  %s101_s23 = sshll.u32 %s677_s22, 4  ;;  %s102_s23 = int_to_ptr.vmem [resolvable:$true] %s101_s23 }
  0x15   : > { %p566_p0 = scmp.ne.s32.totalorder %s912_s0, %s565_s27  ;;  %p572_p5 = scmp.lt.u32.totalorder %s565_s27, %s912_s0 }
  0x16   : > { %p760_p13 = pnand %p752_p11, %p501_p12 }
  0x18   : > { %p567_p1 = pneg %p760_p13 }
  0x1a   : > { %p568_p2 = pnand %p567_p1, %p566_p0 }
  0x1c   : > { %p569_p3 = pneg %p568_p2 }
  0x1e   : > { %p574_p6 = pnand %p572_p5, %p569_p3 }
  0x20   : > { %577 = shalt.err (!%p574_p6)
}
  0x21   : > { %s578_s3 = scalar_lea.vmem %s102_s23, 8192  ;;  %p586_p8 = scmp.lt.s32.totalorder %s102_s23, %s102_s23 }
  0x22   : > { %p579_p7 = scmp.ne.s32.totalorder %s102_s23, %s578_s3  ;;  %p587_p4 = scmp.lt.s32.totalorder %s578_s3, %s578_s3 }
  0x24   : > { %p581_p9 = pnand %p579_p7, %p567_p1  ;;  %p588_p11 = por %p587_p4, %p586_p8 }
  0x26   : > { %p582_p12 = pneg %p581_p9 }
  0x28   : > { %p589_p10 = pnand %p588_p11, %p582_p12 }
  0x2a   : > { %592 = shalt.err (!%p589_p10)
}
  0x2b   : > { %s678_s4 = smov 256   ;;  %s679_s5 = smov 16  }
  0x2c   : > { %504 = dma.hbm_to_vmem [thread:$0]  (!%p760_p13), %s912_s0, 8192, %s102_s23, [#allocation3], %s678_s4, %s678_s4, %s679_s5  }
  0x2d   : > { %p923_p0 = scmp.ne.s32.totalorder %s920_s20, 0 }
  0x2e   : > { %p924_p2 = scmp.ne.s32.totalorder (!%p923_p0), %s921_s21, 0 }
  0x2f   : > { %117 = sbr.rel (%p923_p0) target bundleno = 324 (0x144), region = 24 }
  0x36   : > { %646 = dma.done.wait (%p924_p2), [#allocation3], 8192  }
  0x37   : > { %648 = vsyncadd (%p924_p2), [#allocation3], 4294959104  ;;  %v135_v0 = vld [vmem:[#allocation2 + $0x8] sm:$0xff]  ;;  %v134_v1 = vld [vmem:[#allocation2] sm:$0xff]  ;;  %s129_s15 = sand.u32 1, %s659_s7   ;;  %s494_s21 = sshll.u32 %s667_s9, 13 }
  0x38   : > { %230 = vxpose.xlu1.b32.start [1/16] %v135_v0, 128  ;;  %198 = vxpose.xlu0.b32.start [1/16] %v134_v1, 128  ;;  %v137_v2 = vld [vmem:[#allocation2 + $0x18] sm:$0xff]  ;;  %v136_v3 = vld [vmem:[#allocation2 + $0x10] sm:$0xff]  ;;  %v139_v4 = vld [vmem:[#allocation2 + $0x28] sm:$0xff]  ;;  %s488_s17 = sshll.u32 %s129_s15, 9  ;;  %s858_s25 = scalar_lea.hbm %s913_s1, %s494_s21 }
  0x39   : > { %v138_v5 = vld [vmem:[#allocation2 + $0x20] sm:$0xff]  ;;  %v141_v6 = vld [vmem:[#allocation2 + $0x38] sm:$0xff]  ;;  %v140_v7 = vld [vmem:[#allocation2 + $0x30] sm:$0xff]  ;;  %s789_s20 = scalar_lea.vmem [#allocation5], %s488_s17  ;;  %s866_s9 = scalar_lea.sflag [#allocation4], %s129_s15 }
  0x3a   : > { %v143_v8 = vld [vmem:[#allocation2 + $0x48] sm:$0xff]  ;;  %v142_v9 = vld [vmem:[#allocation2 + $0x40] sm:$0xff]  ;;  %v145_v10 = vld [vmem:[#allocation2 + $0x58] sm:$0xff]  ;;  %s407_s22 = sshll.u32 %s789_s20, 4  ;;  %p925_p8 = scmp.ne.s32.totalorder %s918_s16, 0  ;;  %s860_s22 = int_to_ptr.vmem [resolvable:$true] %s407_s22 }
  0x3b   : > { %v144_v11 = vld [vmem:[#allocation2 + $0x50] sm:$0xff]  ;;  %v147_v12 = vld [vmem:[#allocation2 + $0x68] sm:$0xff]  ;;  %v146_v13 = vld [vmem:[#allocation2 + $0x60] sm:$0xff]  ;;  %s593_s26 = scalar_lea.vmem %s860_s22, 8192  ;;  %s680_s27 = smov [#allocation5]  }
  0x3c   : > { %231 = vxpose.xlu1.b32.cont [2/16] %v137_v2, 128  ;;  %199 = vxpose.xlu0.b32.cont [2/16] %v136_v3, 128  ;;  %v149_v14 = vld [vmem:[#allocation2 + $0x78] sm:$0xff]  ;;  %v148_v15 = vld [vmem:[#allocation2 + $0x70] sm:$0xff]  ;;  %v151_v16 = vld [vmem:[#allocation2 + $0x88] sm:$0xff]  ;;  %p594_p4 = scmp.ne.s32.totalorder %s860_s22, %s593_s26  ;;  %s597_s28 = sshll.u32 %s680_s27, 4  ;;  %s598_s28 = int_to_ptr.vmem [resolvable:$false] %s597_s28 }
  0x3d   : > { %v150_v17 = vld [vmem:[#allocation2 + $0x80] sm:$0xff]  ;;  %v153_v18 = vld [vmem:[#allocation2 + $0x98] sm:$0xff]  ;;  %v152_v19 = vld [vmem:[#allocation2 + $0x90] sm:$0xff]  ;;  %s599_s29 = scalar_lea.vmem %s598_s28, 16384  ;;  %p600_p13 = scmp.lt.s32.totalorder %s860_s22, %s598_s28 }
  0x3e   : > { %v155_v20 = vld [vmem:[#allocation2 + $0xa8] sm:$0xff]  ;;  %v154_v21 = vld [vmem:[#allocation2 + $0xa0] sm:$0xff]  ;;  %v157_v22 = vld [vmem:[#allocation2 + $0xb8] sm:$0xff]  ;;  %p595_p10 = pnand %p594_p4, %p925_p8  ;;  %p601_p1 = scmp.lt.s32.totalorder %s599_s29, %s593_s26 }
  0x3f   : > { %v156_v23 = vld [vmem:[#allocation2 + $0xb0] sm:$0xff]  ;;  %v159_v24 = vld [vmem:[#allocation2 + $0xc8] sm:$0xff]  ;;  %v158_v25 = vld [vmem:[#allocation2 + $0xc0] sm:$0xff] }
  0x40   : > { %232 = vxpose.xlu1.b32.cont [3/16] %v139_v4, 128  ;;  %200 = vxpose.xlu0.b32.cont [3/16] %v138_v5, 128  ;;  %v161_v26 = vld [vmem:[#allocation2 + $0xd8] sm:$0xff]  ;;  %v160_v27 = vld [vmem:[#allocation2 + $0xd0] sm:$0xff]  ;;  %v163_v28 = vld [vmem:[#allocation2 + $0xe8] sm:$0xff]  ;;  %p596_p11 = pneg %p595_p10  ;;  %p602_p3 = por %p601_p1, %p600_p13 }
  0x41   : > { %v162_v29 = vld [vmem:[#allocation2 + $0xe0] sm:$0xff]  ;;  %v165_v30 = vld [vmem:[#allocation2 + $0xf8] sm:$0xff]  ;;  %v164_v31 = vld [vmem:[#allocation2 + $0xf0] sm:$0xff] }
  0x42   : > { %v167_v32 = vld [vmem:[#allocation2 + $0x108] sm:$0xff]  ;;  %v166_v33 = vld [vmem:[#allocation2 + $0x100] sm:$0xff]  ;;  %v169_v34 = vld [vmem:[#allocation2 + $0x118] sm:$0xff]  ;;  %p603_p5 = pnand %p602_p3, %p596_p11 }
  0x43   : > { %v168_v35 = vld [vmem:[#allocation2 + $0x110] sm:$0xff]  ;;  %v171_v36 = vld [vmem:[#allocation2 + $0x128] sm:$0xff]  ;;  %v170_v37 = vld [vmem:[#allocation2 + $0x120] sm:$0xff] }
  0x44   : > { %233 = vxpose.xlu1.b32.cont [4/16] %v141_v6, 128  ;;  %201 = vxpose.xlu0.b32.cont [4/16] %v140_v7, 128  ;;  %v173_v38 = vld [vmem:[#allocation2 + $0x138] sm:$0xff]  ;;  %v172_v39 = vld [vmem:[#allocation2 + $0x130] sm:$0xff]  ;;  %v175_v40 = vld [vmem:[#allocation2 + $0x148] sm:$0xff] }
  0x45   : > { %v174_v41 = vld [vmem:[#allocation2 + $0x140] sm:$0xff]  ;;  %v177_v42 = vld [vmem:[#allocation2 + $0x158] sm:$0xff]  ;;  %v176_v43 = vld [vmem:[#allocation2 + $0x150] sm:$0xff] }
  0x46   : > { %v179_v44 = vld [vmem:[#allocation2 + $0x168] sm:$0xff]  ;;  %v178_v45 = vld [vmem:[#allocation2 + $0x160] sm:$0xff]  ;;  %v181_v46 = vld [vmem:[#allocation2 + $0x178] sm:$0xff] }
  0x47   : > { %v180_v47 = vld [vmem:[#allocation2 + $0x170] sm:$0xff]  ;;  %v183_v48 = vld [vmem:[#allocation2 + $0x188] sm:$0xff]  ;;  %v182_v49 = vld [vmem:[#allocation2 + $0x180] sm:$0xff] }
  0x48   : > { %234 = vxpose.xlu1.b32.cont [5/16] %v143_v8, 128  ;;  %202 = vxpose.xlu0.b32.cont [5/16] %v142_v9, 128  ;;  %v185_v50 = vld [vmem:[#allocation2 + $0x198] sm:$0xff]  ;;  %v184_v51 = vld [vmem:[#allocation2 + $0x190] sm:$0xff]  ;;  %v187_v52 = vld [vmem:[#allocation2 + $0x1a8] sm:$0xff] }
  0x49   : > { %v186_v53 = vld [vmem:[#allocation2 + $0x1a0] sm:$0xff]  ;;  %v189_v54 = vld [vmem:[#allocation2 + $0x1b8] sm:$0xff]  ;;  %v188_v55 = vld [vmem:[#allocation2 + $0x1b0] sm:$0xff] }
  0x4a   : > { %v191_v56 = vld [vmem:[#allocation2 + $0x1c8] sm:$0xff]  ;;  %v190_v57 = vld [vmem:[#allocation2 + $0x1c0] sm:$0xff]  ;;  %v193_v58 = vld [vmem:[#allocation2 + $0x1d8] sm:$0xff] }
  0x4b   : > { %v192_v59 = vld [vmem:[#allocation2 + $0x1d0] sm:$0xff]  ;;  %v195_v60 = vld [vmem:[#allocation2 + $0x1e8] sm:$0xff]  ;;  %v194_v61 = vld [vmem:[#allocation2 + $0x1e0] sm:$0xff] }
  0x4c   : > { %235 = vxpose.xlu1.b32.cont [6/16] %v145_v10, 128  ;;  %203 = vxpose.xlu0.b32.cont [6/16] %v144_v11, 128  ;;  %v197_v62 = vld [vmem:[#allocation2 + $0x1f8] sm:$0xff]  ;;  %v196_v63 = vld [vmem:[#allocation2 + $0x1f0] sm:$0xff] }
  0x50   : > { %236 = vxpose.xlu1.b32.cont [7/16] %v147_v12, 128  ;;  %204 = vxpose.xlu0.b32.cont [7/16] %v146_v13, 128 }
  0x54   : > { %237 = vxpose.xlu1.b32.cont [8/16] %v149_v14, 128  ;;  %205 = vxpose.xlu0.b32.cont [8/16] %v148_v15, 128 }
  0x58   : > { %238 = vxpose.xlu1.b32.cont [9/16] %v151_v16, 128  ;;  %206 = vxpose.xlu0.b32.cont [9/16] %v150_v17, 128 }
  0x5c   : > { %239 = vxpose.xlu1.b32.cont [10/16] %v153_v18, 128  ;;  %207 = vxpose.xlu0.b32.cont [10/16] %v152_v19, 128 }
  0x60   : > { %240 = vxpose.xlu1.b32.cont [11/16] %v155_v20, 128  ;;  %208 = vxpose.xlu0.b32.cont [11/16] %v154_v21, 128 }
  0x64   : > { %241 = vxpose.xlu1.b32.cont [12/16] %v157_v22, 128  ;;  %209 = vxpose.xlu0.b32.cont [12/16] %v156_v23, 128 }
  0x68   : > { %242 = vxpose.xlu1.b32.cont [13/16] %v159_v24, 128  ;;  %210 = vxpose.xlu0.b32.cont [13/16] %v158_v25, 128 }
  0x6c   : > { %243 = vxpose.xlu1.b32.cont [14/16] %v161_v26, 128  ;;  %211 = vxpose.xlu0.b32.cont [14/16] %v160_v27, 128 }
  0x70   : > { %244 = vxpose.xlu1.b32.cont [15/16] %v163_v28, 128  ;;  %212 = vxpose.xlu0.b32.cont [15/16] %v162_v29, 128 }
  0x74   : > { %245 = vxpose.xlu1.b32.end [16/16] %v165_v30, 128  ;;  %213 = vxpose.xlu0.b32.end [16/16] %v164_v31, 128 }
  0x78   : > { %294 = vxpose.xlu1.b32.start [1/16] %v167_v32, 128  ;;  %262 = vxpose.xlu0.b32.start [1/16] %v166_v33, 128 }
  0x7c   : > { %295 = vxpose.xlu1.b32.cont [2/16] %v169_v34, 128  ;;  %263 = vxpose.xlu0.b32.cont [2/16] %v168_v35, 128 }
  0x80   : > { %296 = vxpose.xlu1.b32.cont [3/16] %v171_v36, 128  ;;  %264 = vxpose.xlu0.b32.cont [3/16] %v170_v37, 128 }
  0x84   : > { %297 = vxpose.xlu1.b32.cont [4/16] %v173_v38, 128  ;;  %265 = vxpose.xlu0.b32.cont [4/16] %v172_v39, 128 }
  0x88   : > { %298 = vxpose.xlu1.b32.cont [5/16] %v175_v40, 128  ;;  %266 = vxpose.xlu0.b32.cont [5/16] %v174_v41, 128 }
  0x8c   : > { %299 = vxpose.xlu1.b32.cont [6/16] %v177_v42, 128  ;;  %267 = vxpose.xlu0.b32.cont [6/16] %v176_v43, 128 }
  0x90   : > { %300 = vxpose.xlu1.b32.cont [7/16] %v179_v44, 128  ;;  %268 = vxpose.xlu0.b32.cont [7/16] %v178_v45, 128 }
  0x94   : > { %301 = vxpose.xlu1.b32.cont [8/16] %v181_v46, 128  ;;  %269 = vxpose.xlu0.b32.cont [8/16] %v180_v47, 128 }
  0x98   : > { %302 = vxpose.xlu1.b32.cont [9/16] %v183_v48, 128  ;;  %270 = vxpose.xlu0.b32.cont [9/16] %v182_v49, 128 }
  0x9c   : > { %303 = vxpose.xlu1.b32.cont [10/16] %v185_v50, 128  ;;  %271 = vxpose.xlu0.b32.cont [10/16] %v184_v51, 128 }
  0xa0   : > { %304 = vxpose.xlu1.b32.cont [11/16] %v187_v52, 128  ;;  %272 = vxpose.xlu0.b32.cont [11/16] %v186_v53, 128 }
  0xa4   : > { %305 = vxpose.xlu1.b32.cont [12/16] %v189_v54, 128  ;;  %273 = vxpose.xlu0.b32.cont [12/16] %v188_v55, 128 }
  0xa8   : > { %306 = vxpose.xlu1.b32.cont [13/16] %v191_v56, 128  ;;  %274 = vxpose.xlu0.b32.cont [13/16] %v190_v57, 128 }
  0xac   : > { %307 = vxpose.xlu1.b32.cont [14/16] %v193_v58, 128  ;;  %275 = vxpose.xlu0.b32.cont [14/16] %v192_v59, 128 }
  0xb0   : > { %308 = vxpose.xlu1.b32.cont [15/16] %v195_v60, 128  ;;  %276 = vxpose.xlu0.b32.cont [15/16] %v194_v61, 128 }
  0xb4   : > { %309 = vxpose.xlu1.b32.end [16/16] %v197_v62, 128  ;;  %277 = vxpose.xlu0.b32.end [16/16] %v196_v63, 128 }
  0xb8   : > { %v246_v0 = vpop.trf.xlu1  ;;  %v214_v1 = vpop.trf.xlu0 }
  0xb9   : > { %358 = vst [vmem:[%s789_s20 + $0x100] sm:$0xff] %v246_v0  ;;  %326 = vst [vmem:[%s789_s20] sm:$0xff] %v214_v1 }
  0xbc   : > { %v247_v2 = vpop.trf.xlu1  ;;  %v215_v3 = vpop.trf.xlu0 }
  0xbd   : > { %360 = vst [vmem:[%s789_s20 + $0x110] sm:$0xff] %v247_v2  ;;  %328 = vst [vmem:[%s789_s20 + $0x10] sm:$0xff] %v215_v3 }
  0xc0   : > { %v248_v4 = vpop.trf.xlu1  ;;  %v216_v5 = vpop.trf.xlu0 }
  0xc1   : > { %362 = vst [vmem:[%s789_s20 + $0x120] sm:$0xff] %v248_v4  ;;  %330 = vst [vmem:[%s789_s20 + $0x20] sm:$0xff] %v216_v5 }
  0xc4   : > { %v249_v6 = vpop.trf.xlu1  ;;  %v217_v7 = vpop.trf.xlu0 }
  0xc5   : > { %364 = vst [vmem:[%s789_s20 + $0x130] sm:$0xff] %v249_v6  ;;  %332 = vst [vmem:[%s789_s20 + $0x30] sm:$0xff] %v217_v7 }
  0xc8   : > { %v250_v8 = vpop.trf.xlu1  ;;  %v218_v9 = vpop.trf.xlu0 }
  0xc9   : > { %366 = vst [vmem:[%s789_s20 + $0x140] sm:$0xff] %v250_v8  ;;  %334 = vst [vmem:[%s789_s20 + $0x40] sm:$0xff] %v218_v9 }
  0xcc   : > { %v251_v10 = vpop.trf.xlu1  ;;  %v219_v11 = vpop.trf.xlu0 }
  0xcd   : > { %368 = vst [vmem:[%s789_s20 + $0x150] sm:$0xff] %v251_v10  ;;  %336 = vst [vmem:[%s789_s20 + $0x50] sm:$0xff] %v219_v11 }
  0xd0   : > { %v252_v12 = vpop.trf.xlu1  ;;  %v220_v13 = vpop.trf.xlu0 }
  0xd1   : > { %370 = vst [vmem:[%s789_s20 + $0x160] sm:$0xff] %v252_v12  ;;  %338 = vst [vmem:[%s789_s20 + $0x60] sm:$0xff] %v220_v13 }
  0xd4   : > { %v253_v14 = vpop.trf.xlu1  ;;  %v221_v15 = vpop.trf.xlu0 }
  0xd5   : > { %372 = vst [vmem:[%s789_s20 + $0x170] sm:$0xff] %v253_v14  ;;  %340 = vst [vmem:[%s789_s20 + $0x70] sm:$0xff] %v221_v15 }
  0xd8   : > { %v254_v16 = vpop.trf.xlu1  ;;  %v222_v17 = vpop.trf.xlu0 }
  0xd9   : > { %374 = vst [vmem:[%s789_s20 + $0x180] sm:$0xff] %v254_v16  ;;  %342 = vst [vmem:[%s789_s20 + $0x80] sm:$0xff] %v222_v17 }
  0xdc   : > { %v255_v18 = vpop.trf.xlu1  ;;  %v223_v19 = vpop.trf.xlu0 }
  0xdd   : > { %376 = vst [vmem:[%s789_s20 + $0x190] sm:$0xff] %v255_v18  ;;  %344 = vst [vmem:[%s789_s20 + $0x90] sm:$0xff] %v223_v19 }
  0xe0   : > { %v256_v20 = vpop.trf.xlu1  ;;  %v224_v21 = vpop.trf.xlu0 }
  0xe1   : > { %378 = vst [vmem:[%s789_s20 + $0x1a0] sm:$0xff] %v256_v20  ;;  %346 = vst [vmem:[%s789_s20 + $0xa0] sm:$0xff] %v224_v21 }
  0xe4   : > { %v257_v22 = vpop.trf.xlu1  ;;  %v225_v23 = vpop.trf.xlu0 }
  0xe5   : > { %380 = vst [vmem:[%s789_s20 + $0x1b0] sm:$0xff] %v257_v22  ;;  %348 = vst [vmem:[%s789_s20 + $0xb0] sm:$0xff] %v225_v23 }
  0xe8   : > { %v258_v24 = vpop.trf.xlu1  ;;  %v226_v25 = vpop.trf.xlu0 }
  0xe9   : > { %382 = vst [vmem:[%s789_s20 + $0x1c0] sm:$0xff] %v258_v24  ;;  %350 = vst [vmem:[%s789_s20 + $0xc0] sm:$0xff] %v226_v25 }
  0xec   : > { %v259_v26 = vpop.trf.xlu1  ;;  %v227_v27 = vpop.trf.xlu0 }
  0xed   : > { %384 = vst [vmem:[%s789_s20 + $0x1d0] sm:$0xff] %v259_v26  ;;  %352 = vst [vmem:[%s789_s20 + $0xd0] sm:$0xff] %v227_v27 }
  0xf0   : > { %v260_v28 = vpop.trf.xlu1  ;;  %v228_v29 = vpop.trf.xlu0 }
  0xf1   : > { %386 = vst [vmem:[%s789_s20 + $0x1e0] sm:$0xff] %v260_v28  ;;  %354 = vst [vmem:[%s789_s20 + $0xe0] sm:$0xff] %v228_v29 }
  0xf4   : > { %v261_v30 = vpop.trf.xlu1  ;;  %v229_v31 = vpop.trf.xlu0 }
  0xf5   : > { %388 = vst [vmem:[%s789_s20 + $0x1f0] sm:$0xff] %v261_v30  ;;  %356 = vst [vmem:[%s789_s20 + $0xf0] sm:$0xff] %v229_v31 }
  0xf8   : > { %v310_v32 = vpop.trf.xlu1  ;;  %v278_v33 = vpop.trf.xlu0 }
  0xf9   : > { %359 = vst [vmem:[%s789_s20 + $0x108] sm:$0xff] %v310_v32  ;;  %327 = vst [vmem:[%s789_s20 + $0x8] sm:$0xff] %v278_v33 }
  0xfc   : > { %v311_v34 = vpop.trf.xlu1  ;;  %v279_v35 = vpop.trf.xlu0 }
  0xfd   : > { %361 = vst [vmem:[%s789_s20 + $0x118] sm:$0xff] %v311_v34  ;;  %329 = vst [vmem:[%s789_s20 + $0x18] sm:$0xff] %v279_v35 }
 0x100   : > { %v312_v36 = vpop.trf.xlu1  ;;  %v280_v37 = vpop.trf.xlu0 }
 0x101   : > { %363 = vst [vmem:[%s789_s20 + $0x128] sm:$0xff] %v312_v36  ;;  %331 = vst [vmem:[%s789_s20 + $0x28] sm:$0xff] %v280_v37 }
 0x104   : > { %v313_v38 = vpop.trf.xlu1  ;;  %v281_v39 = vpop.trf.xlu0 }
 0x105   : > { %365 = vst [vmem:[%s789_s20 + $0x138] sm:$0xff] %v313_v38  ;;  %333 = vst [vmem:[%s789_s20 + $0x38] sm:$0xff] %v281_v39 }
 0x108   : > { %v314_v40 = vpop.trf.xlu1  ;;  %v282_v41 = vpop.trf.xlu0 }
 0x109   : > { %367 = vst [vmem:[%s789_s20 + $0x148] sm:$0xff] %v314_v40  ;;  %335 = vst [vmem:[%s789_s20 + $0x48] sm:$0xff] %v282_v41 }
 0x10c   : > { %v315_v42 = vpop.trf.xlu1  ;;  %v283_v43 = vpop.trf.xlu0 }
 0x10d   : > { %369 = vst [vmem:[%s789_s20 + $0x158] sm:$0xff] %v315_v42  ;;  %337 = vst [vmem:[%s789_s20 + $0x58] sm:$0xff] %v283_v43 }
 0x110   : > { %v316_v44 = vpop.trf.xlu1  ;;  %v284_v45 = vpop.trf.xlu0 }
 0x111   : > { %371 = vst [vmem:[%s789_s20 + $0x168] sm:$0xff] %v316_v44  ;;  %339 = vst [vmem:[%s789_s20 + $0x68] sm:$0xff] %v284_v45 }
 0x114   : > { %v317_v46 = vpop.trf.xlu1  ;;  %v285_v47 = vpop.trf.xlu0 }
 0x115   : > { %373 = vst [vmem:[%s789_s20 + $0x178] sm:$0xff] %v317_v46  ;;  %341 = vst [vmem:[%s789_s20 + $0x78] sm:$0xff] %v285_v47 }
 0x118   : > { %v318_v48 = vpop.trf.xlu1  ;;  %v286_v49 = vpop.trf.xlu0 }
 0x119   : > { %375 = vst [vmem:[%s789_s20 + $0x188] sm:$0xff] %v318_v48  ;;  %343 = vst [vmem:[%s789_s20 + $0x88] sm:$0xff] %v286_v49 }
 0x11c   : > { %v319_v50 = vpop.trf.xlu1  ;;  %v287_v51 = vpop.trf.xlu0 }
 0x11d   : > { %377 = vst [vmem:[%s789_s20 + $0x198] sm:$0xff] %v319_v50  ;;  %345 = vst [vmem:[%s789_s20 + $0x98] sm:$0xff] %v287_v51 }
 0x120   : > { %v320_v52 = vpop.trf.xlu1  ;;  %v288_v53 = vpop.trf.xlu0 }
 0x121   : > { %379 = vst [vmem:[%s789_s20 + $0x1a8] sm:$0xff] %v320_v52  ;;  %347 = vst [vmem:[%s789_s20 + $0xa8] sm:$0xff] %v288_v53 }
 0x124   : > { %v321_v54 = vpop.trf.xlu1  ;;  %v289_v55 = vpop.trf.xlu0 }
 0x125   : > { %381 = vst [vmem:[%s789_s20 + $0x1b8] sm:$0xff] %v321_v54  ;;  %349 = vst [vmem:[%s789_s20 + $0xb8] sm:$0xff] %v289_v55 }
 0x128   : > { %v322_v56 = vpop.trf.xlu1  ;;  %v290_v57 = vpop.trf.xlu0 }
 0x129   : > { %383 = vst [vmem:[%s789_s20 + $0x1c8] sm:$0xff] %v322_v56  ;;  %351 = vst [vmem:[%s789_s20 + $0xc8] sm:$0xff] %v290_v57 }
 0x12c   : > { %v323_v58 = vpop.trf.xlu1  ;;  %v291_v59 = vpop.trf.xlu0 }
 0x12d   : > { %385 = vst [vmem:[%s789_s20 + $0x1d8] sm:$0xff] %v323_v58  ;;  %353 = vst [vmem:[%s789_s20 + $0xd8] sm:$0xff] %v291_v59 }
 0x130   : > { %v324_v60 = vpop.trf.xlu1  ;;  %v292_v61 = vpop.trf.xlu0 }
 0x131   : > { %387 = vst [vmem:[%s789_s20 + $0x1e8] sm:$0xff] %v324_v60  ;;  %355 = vst [vmem:[%s789_s20 + $0xe8] sm:$0xff] %v292_v61 }
 0x134   : > { %v325_v62 = vpop.trf.xlu1  ;;  %v293_v63 = vpop.trf.xlu0 }
 0x135   : > { %389 = vst [vmem:[%s789_s20 + $0x1f8] sm:$0xff] %v325_v62  ;;  %357 = vst [vmem:[%s789_s20 + $0xf8] sm:$0xff] %v293_v63 }
 0x136   : > { %606 = shalt.err (!%p603_p5)
}
 0x137   : > { %s607_s30 = scalar_lea.hbm %s858_s25, 8192  ;;  %s611_s4 = scalar_lea.hbm %s913_s1, 16384 }
 0x138   : > { %p608_p6 = scmp.ne.s32.totalorder %s858_s25, %s607_s30  ;;  %p612_p12 = scmp.lt.u32.totalorder %s858_s25, %s913_s1 }
 0x139   : > { %p613_p0 = scmp.lt.u32.totalorder %s611_s4, %s607_s30  ;;  %p615_p4 = scmp.lt.u32.totalorder %s607_s30, %s858_s25 }
 0x13a   : > { %p609_p7 = pnand %p608_p6, %p925_p8 }
 0x13b   : > { %p614_p2 = por %p613_p0, %p612_p12 }
 0x13c   : > { %p610_p9 = pneg %p609_p7 }
 0x13d   : > { %p616_p10 = por %p615_p4, %p614_p2 }
 0x13f   : > { %p617_p11 = pnand %p616_p10, %p610_p9 }
 0x141   : > { %620 = shalt.err (!%p617_p11)
}
 0x142   : > { %s681_s13 = smov 256   ;;  %s682_s15 = smov 16  }
 0x143   : > { %499 = dma.vmem_to_hbm [thread:$0]  (%p925_p8), %s860_s22, 8192, %s858_s25, %s866_s9, %s681_s13, %s681_s13, %s682_s15  }
 0x144 PF: > { %p511_p13 = scmp.ge.s32.totalorder %s675_s11, 2  ;;  %s422_s17 = sand.u32 1, %s655_s6  }
 0x145   : > { %p926_p1 = scmp.ne.s32.totalorder %s919_s18, 0  ;;  %s423_s20 = scalar_lea.sflag [#allocation4], %s422_s17 }
 0x147   : > { %p506_p3 = pnand %p511_p13, %p926_p1 }
 0x149   : > { %650 = dma.done.wait (!%p506_p3), %s423_s20, 8192  }
 0x14a   : > { %652 = vsyncadd (!%p506_p3), %s423_s20, 4294959104  ;;  %s15_s11 = sadd.s32 1, %s675_s11   ;;  %s927_s6 = smov %s659_s7 }
 0x14b   : > { %p12_p5 = scmp.ge.s32.totalorder %s15_s11, 4   ;;  %s928_s7 = smov %s663_s8 }
 0x14c   : > { %s929_s8 = smov %s746_s19  ;;  %s930_s9 = smov %s671_s10 }
 0x14d   : > { %s931_s10 = smov %s933_s14  ;;  %14 = sbr.rel (!%p12_p5) target bundleno = 5 (0x5), region = 62 }
 0x154   :  { %428 = vsyncpa [#allocation3], 1 }
 0x155   :  { %430 = vsyncpa [#allocation3 + $0x1], 1 }
 0x156   :  { %431 = vsyncpa [#allocation4], 1 }
 0x157   :  { %433 = vsyncpa [#allocation4 + $0x1], 1 }

</bundles_post_ra>
